<compile_context>
chip_gen: v7x
topology: tpu7x:2x2x1
jax: 0.10.0
libtpu: 0.0.40
codegen_flags: <defaults>
</compile_context>

<pallas_src>
import functools

import jax
import jax.numpy as jnp
import numpy as np
from jax import lax
from jax.experimental import pallas as pl
from jax.experimental.pallas import tpu as pltpu


def _outconv_kernel(w_ref, b_ref, p_ref, o2_ref, o1_ref):
    """Single fused matmul for both conv heads.

    w_ref : (Cp, 9*Cin)  bf16  fused weights, rows = [head2 | head1 | zero pad]
    b_ref : (Cp, 1)      f32   fused bias, same row order
    p_ref : (9*Cin, N)   bf16  im2col patches, rows in (dy, dx, cin) order
    o2_ref: (C2, N)      f32   oconv2 output (transposed, lane-dense)
    o1_ref: (C1, N)      f32   oconv1 output (transposed, lane-dense)
    """
    acc = jnp.dot(w_ref[...], p_ref[...], preferred_element_type=jnp.float32)
    acc = acc + b_ref[...]                      # broadcast (Cp,1) over lanes
    c2 = o2_ref.shape[0]
    c1 = o1_ref.shape[0]
    o2_ref[...] = acc[:c2].astype(o2_ref.dtype)
    o1_ref[...] = acc[c2:c2 + c1].astype(o1_ref.dtype)


def prepare_outconv_params(w1_oihw, b1, w2_oihw, b2, compute_dtype=jnp.bfloat16):
    """One-time packing of both conv heads into an MXU-ready fused weight matrix.

    Call once at module init; reuse (w_cat, b_cat) every forward.
    Row order of w_cat / b_cat: [head2 channels | head1 channels | zero pad].
    """
    C1, Cin = w1_oihw.shape[0], w1_oihw.shape[1]
    C2 = w2_oihw.shape[0]
    K9 = 9 * Cin
    Ct = C1 + C2
    Cp = ((Ct + 7) // 8) * 8                 # pad fused Cout to sublane multiple

    def _wmat(w_oihw):                       # OIHW -> (9*Cin, Cout), (dy,dx,cin) rows
        return jnp.transpose(w_oihw, (2, 3, 1, 0)).reshape(K9, -1)

    # Head-2 (8 ch) first so its accumulator slice starts at sublane 0.
    w_cat = jnp.concatenate([_wmat(w2_oihw), _wmat(w1_oihw)], axis=-1).T   # (Ct, K9)
    w_cat = jnp.pad(w_cat, ((0, Cp - Ct), (0, 0))).astype(compute_dtype)
    b_cat = jnp.pad(jnp.concatenate([b2, b1]).astype(jnp.float32),
                    (0, Cp - Ct)).reshape(Cp, 1)
    return w_cat, b_cat


def _flatten_from_t(o_t, B, H, W, k):
    """flatten_conv applied to the kernel's transposed (C, B*H*W) output.

    o_t[c, b*H*W + h*W + w] == conv[b, c, h, w]   (NCHW conv output)
    flatten_conv: y[b, (w*H + h)*k + j, c'] = conv[b, j*(C//k) + c', h, w]
    """
    C = o_t.shape[0]
    cpk = C // k
    o = o_t.reshape(k, cpk, B, H, W)
    o = jnp.transpose(o, (2, 4, 3, 0, 1))        # (b, w, h, j, c')
    return o.reshape(B, W * H * k, cpk)


def out_conv_forward(x_nchw, w_cat, b_cat, *, C1, C2, k,
                     compute_dtype=jnp.bfloat16, block_n=1024):
    """OutConv.forward(x) -> [flatten_conv(oconv1(x), k), flatten_conv(oconv2(x), k)]."""
    B, Cin, H, W = x_nchw.shape
    N = B * H * W
    K9 = 9 * Cin
    Cp = w_cat.shape[0]

    # ---- channel-first im2col (no minor-dim transposes) ----
    # Rows stacked in (dy, dx, cin) order, in lockstep with w_cat's rows.
    x_cf = jnp.transpose(x_nchw, (1, 0, 2, 3)).astype(compute_dtype)   # (Cin,B,H,W)
    x_pad = jnp.pad(x_cf, ((0, 0), (0, 0), (1, 1), (1, 1)))
    patches_t = jnp.concatenate(
        [x_pad[:, :, dy:dy + H, dx:dx + W].reshape(Cin, N)
         for dy in range(3) for dx in range(3)], axis=0)               # (9*Cin, N)

    out_dtype = jnp.float32
    out_shape = (jax.ShapeDtypeStruct((C2, N), out_dtype),
                 jax.ShapeDtypeStruct((C1, N), out_dtype))
    cost = pl.CostEstimate(
        flops=2 * Cp * K9 * N,
        transcendentals=0,
        bytes_accessed=(w_cat.size * w_cat.dtype.itemsize
                        + b_cat.size * b_cat.dtype.itemsize
                        + patches_t.size * patches_t.dtype.itemsize
                        + (C1 + C2) * N * 4))

    if N % block_n == 0 and N // block_n >= 4:
        # Large-N path (batched scales / v7x 2-TC): shard lane axis across grid
        # steps; per-block work then amortizes the ~0.35 us/step overhead.
        out2_t, out1_t = pl.pallas_call(
            _outconv_kernel,
            out_shape=out_shape,
            grid=(N // block_n,),
            in_specs=[pl.BlockSpec((Cp, K9), lambda i: (0, 0)),
                      pl.BlockSpec((Cp, 1), lambda i: (0, 0)),
                      pl.BlockSpec((K9, block_n), lambda i: (0, i))],
            out_specs=[pl.BlockSpec((C2, block_n), lambda i: (0, i)),
                       pl.BlockSpec((C1, block_n), lambda i: (0, i))],
            compiler_params=pltpu.CompilerParams(
                dimension_semantics=("parallel",)),
            cost_estimate=cost,
        )(w_cat, b_cat, patches_t)
    else:
        # Small-N path: whole problem ~100 KiB -> single gridless invocation
        # (correct choice on single-TC v5e/v6e; neutral on v7x at this size).
        out2_t, out1_t = pl.pallas_call(
            _outconv_kernel,
            out_shape=out_shape,
            in_specs=[pl.BlockSpec(memory_space=pltpu.MemorySpace.VMEM)] * 3,
            out_specs=[pl.BlockSpec(memory_space=pltpu.MemorySpace.VMEM)] * 2,
            cost_estimate=cost,
        )(w_cat, b_cat, patches_t)

    return [_flatten_from_t(out1_t, B, H, W, k),
            _flatten_from_t(out2_t, B, H, W, k)]


def _torch_reference(x_nchw, w_oihw, b, k):
    """Pure-JAX NCHW reference matching PyTorch conv2d + flatten_conv."""
    conv = lax.conv_general_dilated(
        x_nchw, w_oihw, window_strides=(1, 1), padding=((1, 1), (1, 1)),
        dimension_numbers=('NCHW', 'OIHW', 'NCHW'))
    conv = conv + b.reshape(1, -1, 1, 1)
    bs, nf, gx, gy = conv.shape
    y = jnp.transpose(conv, (0, 3, 2, 1))    # permute(0, 3, 2, 1)
    return y.reshape(bs, -1, nf // k)        # view(bs, -1, nf // k)


if __name__ == "__main__":
    # Module config: OutConv(k=2, n_in=4, bias=-4.0); len(id2cat) + 1 == 3
    k = 2
    n_in = 4
    bias_val = -4.0
    B, H, W = 2, 16, 16
    n_cls = 3
    C1 = n_cls * k   # oconv1 out channels = 6
    C2 = 4 * k       # oconv2 out channels = 8

    key = jax.random.PRNGKey(0)
    k1, k2, k3, k4 = jax.random.split(key, 4)
    x = jax.random.normal(k1, (B, n_in, H, W), jnp.float32)
    w1 = jax.random.normal(k2, (C1, n_in, 3, 3), jnp.float32) * 0.1
    w2 = jax.random.normal(k3, (C2, n_in, 3, 3), jnp.float32) * 0.1
    # oconv1.bias.data.zero_().add_(bias)
    b1 = jnp.full((C1,), bias_val, jnp.float32)
    # oconv2 keeps its (random) default init
    b2 = jax.random.normal(k4, (C2,), jnp.float32) * 0.1

    # One-time weight/bias packing (hoisted out of the per-call path).
    w_cat, b_cat = prepare_outconv_params(w1, b1, w2, b2)

    fwd = jax.jit(functools.partial(out_conv_forward, C1=C1, C2=C2, k=k))
    out1, out2 = fwd(x, w_cat, b_cat)
    jax.block_until_ready((out1, out2))

    ref1 = _torch_reference(x, w1, b1, k)
    ref2 = _torch_reference(x, w2, b2, k)
    assert out1.shape == (B, H * W * k, n_cls), out1.shape
    assert out2.shape == (B, H * W * k, 4), out2.shape
    # bf16 operands (f32 accumulation) -> relaxed tolerance vs. f32 reference.
    np.testing.assert_allclose(np.asarray(out1), np.asarray(ref1),
                               rtol=3e-2, atol=3e-2)
    np.testing.assert_allclose(np.asarray(out2), np.asarray(ref2),
                               rtol=3e-2, atol=3e-2)
    print("KERNEL_OK")
</pallas_src>

<mosaic_0001>
module attributes {stable_mosaic.version = 11 : i64} {
  func.func @_outconv_kernel(%arg0: memref<16x36xbf16, #tpu.memory_space<vmem>>, %arg1: memref<16x1xf32, #tpu.memory_space<vmem>>, %arg2: memref<36x512xbf16, #tpu.memory_space<vmem>>, %arg3: memref<8x512xf32, #tpu.memory_space<vmem>>, %arg4: memref<6x512xf32, #tpu.memory_space<vmem>>) attributes {dimension_semantics = [], scalar_prefetch = 0 : i64, scratch_operands = 0 : i64, tpu.core_type = #tpu.core_type<tc>} {
    %c0 = arith.constant 0 : index
    %c0_0 = arith.constant 0 : index
    %0 = vector.load %arg0[%c0, %c0_0] : memref<16x36xbf16, #tpu.memory_space<vmem>>, vector<16x36xbf16>
    %c0_1 = arith.constant 0 : index
    %c0_2 = arith.constant 0 : index
    %1 = vector.load %arg2[%c0_1, %c0_2] : memref<36x512xbf16, #tpu.memory_space<vmem>>, vector<36x512xbf16>
    %cst = arith.constant dense<0.000000e+00> : vector<16x512xf32>
    %2 = tpu.matmul %0, %1, %cst {dimension_numbers = #tpu.dot_dimension_numbers<[1], [0], [0], [1], [0, 0, 1, 1], [], []>} : vector<16x36xbf16>, vector<36x512xbf16>, vector<16x512xf32> -> vector<16x512xf32>
    %c0_3 = arith.constant 0 : index
    %c0_4 = arith.constant 0 : index
    %3 = vector.load %arg1[%c0_3, %c0_4] : memref<16x1xf32, #tpu.memory_space<vmem>>, vector<16x1xf32>
    %4 = vector.broadcast %3 : vector<16x1xf32> to vector<16x512xf32>
    %5 = arith.addf %2, %4 : vector<16x512xf32>
    %6 = vector.extract_strided_slice %5 {offsets = [0, 0], sizes = [8, 512], strides = [1, 1]} : vector<16x512xf32> to vector<8x512xf32>
    %c0_5 = arith.constant 0 : index
    %c0_6 = arith.constant 0 : index
    %7 = vector.load %arg3[%c0_5, %c0_6] : memref<8x512xf32, #tpu.memory_space<vmem>>, vector<8x512xf32>
    tpu.vector_store %arg3[%c0_5, %c0_6], %6 {strides = array<i32>} : memref<8x512xf32, #tpu.memory_space<vmem>>, vector<8x512xf32>,
    %8 = vector.extract_strided_slice %5 {offsets = [8, 0], sizes = [6, 512], strides = [1, 1]} : vector<16x512xf32> to vector<6x512xf32>
    %c0_7 = arith.constant 0 : index
    %c0_8 = arith.constant 0 : index
    %9 = vector.load %arg4[%c0_7, %c0_8] : memref<6x512xf32, #tpu.memory_space<vmem>>, vector<6x512xf32>
    tpu.vector_store %arg4[%c0_7, %c0_8], %8 {strides = array<i32>} : memref<6x512xf32, #tpu.memory_space<vmem>>, vector<6x512xf32>,
    return
  }
}

</mosaic_0001>

<bundles_post_ra>
// kernel: out_conv_forward.1
= control target key start
LH: loop header
LB: loop body
LE: loop exit
PB: predicated region body
PF: predicated region fallthrough
CT: control target
= control target key end

     0   :  { %v251_v1 = vmov 0   ;;  %vm100_vm0 = vcmask 1041408   ;;  %vm96_vm1 = vcmask 293888   ;;  %s344_s2 = inlined_call_operand.vmem [shape: bf16[36,512], index: 2, kind: input, shape index: {}]   ;;  %s345_s1 = inlined_call_operand.vmem [shape: f32[16,1], index: 1, kind: input, shape index: {}]   ;;  %s346_s0 = inlined_call_operand.vmem [shape: bf16[16,36], index: 0, kind: input, shape index: {}]   ;;  %s347_s3 = inlined_call_operand.vmem [shape: f32[8,512], index: 3, kind: output, shape index: {0}]   ;;  %s348_s4 = inlined_call_operand.vmem [shape: f32[6,512], index: 4, kind: output, shape index: {1}]  }
   0x1   :  { %v234_v0 = vld [vmem:[%s344_s2 + $0x4] ss:$16 sps:$4 sm:$0xff]   ;;  %145 = vmatprep.mubr.bf16.mxu0 %v251_v1  ;;  %188 = vmatprep.mubr.bf16.mxu1 %v251_v1  ;;  %v236_v2 = vld [vmem:[%s344_s2 + $0xc] ss:$16 sps:$4 sm:$0xff]   ;;  %v238_v3 = vld [vmem:[%s344_s2] ss:$16 sps:$4 sm:$0xff]  }
   0x2   :  { %233 = vset.pattern.permute.xlu0 %v251_v1  ;;  %113 = vmatprep.subr.bf16.mxu0 %v234_v0  ;;  %v239_v4 = vld [vmem:[%s344_s2 + $0x8] ss:$16 sps:$4 sm:$0xff]   ;;  %v240_v5 = vld [vmem:[%s344_s2 + $0x24] ss:$16 sps:$4 sm:$0xff]   ;;  %v242_v6 = vld [vmem:[%s344_s2 + $0x2c] ss:$16 sps:$4 sm:$0xff]  }
   0x3   :  { %156 = vmatprep.subr.bf16.mxu1 %v236_v2  ;;  %114 = vmatpush1.bf16.msra.mxu0 %v238_v3  ;;  %v244_v7 = vld [vmem:[%s344_s2 + $0x20] ss:$16 sps:$4 sm:$0xff]   ;;  %v245_v8 = vld [vmem:[%s344_s2 + $0x28] ss:$16 sps:$4 sm:$0xff]  }
   0x4   :  { %157 = vmatpush1.bf16.msra.mxu1 %v239_v4  ;;  %115 = vmatprep.subr.bf16.mxu0 %v240_v5  ;;  %v27_v9 = vld [vmem:[%s344_s2 + $0x40] sm:$0x33]  ;;  %v28_v10 = vld [vmem:[%s344_s2 + $0x48] sm:$0x33] }
   0x5   :  { %158 = vmatprep.subr.bf16.mxu1 %v242_v6  ;;  %v225_v11 = vcombine.high %v27_v9, %v27_v9  ;;  %v227_v12 = vcombine.high %v28_v10, %v28_v10  ;;  %v224_v13 = vcombine.low %v27_v9, %v27_v9  ;;  %v226_v14 = vcombine.low %v28_v10, %v28_v10  ;;  %v29_v15 = vld [vmem:[%s345_s1] sm:$0xff]  ;;  %v30_v19 = vld [vmem:[%s345_s1 + $0x8] sm:$0xff] }
   0x6   :  { %33 = vperm.xlu0 %233, %v29_v15   ;;  %v250_v18 = vld [vmem:[%s346_s0] sm:$0xff]  }
   0x7   :  { %116 = vmatpush1.bf16.msra.mxu0 %v244_v7  ;;  %v102_v16 = vsel %vm100_vm0, %v224_v13, 0  ;;  %v108_v17 = vsel %vm100_vm0, %v226_v14, 0 }
   0x8   :  { %159 = vmatpush1.bf16.msra.mxu1 %v245_v8  ;;  %228 = vmatprep.subr.msk.bf16.mxu0 %vm100_vm0, %v225_v11 }
   0x9   :  { %230 = vmatprep.subr.msk.bf16.mxu1 %vm100_vm0, %v227_v12 }
   0xa   :  { %38 = vperm.xlu0 %233, %v30_v19  }
   0xb   :  { %118 = vmatpush1.bf16.msra.mxu0 %v102_v16 }
   0xc   :  { %161 = vmatpush1.bf16.msra.mxu1 %v108_v17 }
   0xe   :  { %229 = vmatmul.mubr.msk.bf16.vlgmr.msra.gmra.mrb[0].mxu0 %vm96_vm1, %v250_v18 }
   0xf   :  { %231 = vmatmul.mubr.msk.bf16.vlgmr.msra.gmra.mrb[0].mxu1 %vm96_vm1, %v250_v18 }
  0x85   :  { %v34_v20 = vpop.permute.xlu0 %33 }
  0x89   :  { %v39_v21 = vpop.permute.xlu0 %38 }
  0xe1   :  { %v147_v22 = vpop.f32.mrb[0].mxu0 }
  0xe2   :  { %v190_v23 = vpop.f32.mrb[0].mxu1  ;;  %v148_v24 = vadd.f32 %v147_v22, %v34_v20  ;;  %v149_v26 = vpop.f32.mrb[1].mxu0 }
  0xe3   :  { %v191_v25 = vadd.f32 %v190_v23, %v34_v20  ;;  %v192_v27 = vpop.f32.mrb[1].mxu1  ;;  %v150_v28 = vadd.f32 %v149_v26, %v34_v20  ;;  %v151_v30 = vpop.f32.mrb[2].mxu0 }
  0xe4   :  { %v193_v29 = vadd.f32 %v192_v27, %v34_v20  ;;  %v194_v31 = vpop.f32.mrb[2].mxu1  ;;  %199 = vst [vmem:[%s347_s3] sm:$0xff] %v148_v24  ;;  %v152_v32 = vadd.f32 %v151_v30, %v39_v21  ;;  %v153_v34 = vpop.f32.mrb[3].mxu0 }
  0xe5   :  { %201 = vst [vmem:[%s347_s3 + $0x10] sm:$0xff] %v191_v25  ;;  %v195_v33 = vadd.f32 %v194_v31, %v39_v21  ;;  %v196_v35 = vpop.f32.mrb[3].mxu1  ;;  %200 = vst [vmem:[%s347_s3 + $0x8] sm:$0xff] %v150_v28  ;;  %v154_v36 = vadd.f32 %v153_v34, %v39_v21 }
  0xe6   :  { %202 = vst [vmem:[%s347_s3 + $0x18] sm:$0xff] %v193_v29  ;;  %v197_v37 = vadd.f32 %v196_v35, %v39_v21  ;;  %203 = vst [vmem:[%s348_s4] sm:$0x3f] %v152_v32 }
  0xe7   :  { %205 = vst [vmem:[%s348_s4 + $0x10] sm:$0x3f] %v195_v33  ;;  %204 = vst [vmem:[%s348_s4 + $0x8] sm:$0x3f] %v154_v36 }
  0xe8   :  { %206 = vst [vmem:[%s348_s4 + $0x18] sm:$0x3f] %v197_v37 }

</bundles_post_ra>
